<compile_context>
chip_gen: v6e
topology: v6e:2x2x1
jax: 0.10.0
libtpu: 0.0.40
codegen_flags: <defaults>
</compile_context>

<pallas_src>
import jax
import jax.numpy as jnp
from jax.experimental import pallas as pl
from jax.experimental.pallas import tpu as pltpu

LANE = 128        # vreg lane width
SUBLANE = 8       # vreg sublane count
TILE_ROWS = 4096  # 4096 * 128 * 4B = 2 MiB per f32 tile; safe on v5e/v6e/v7x VMEM


def relu_kernel(x_ref, o_ref):
    # Architectural floor for ReLU: one vld + one vmax (vs. immediate 0) + one vst.
    o_ref[...] = jnp.maximum(x_ref[...], 0.0)


def _relu_lane_dense(x):
    """ReLU over an arbitrary-shaped f32 array via a lane-dense (rows, 128) slab."""
    orig_shape = x.shape
    flat = x.reshape(-1)
    total = flat.shape[0]

    # Rows of 128 lanes; round rows up to a multiple of the sublane count (8),
    # then to a multiple of the tile height so the grid divides evenly.
    rows = pl.cdiv(total, LANE)
    tile_rows = min(TILE_ROWS, pl.cdiv(rows, SUBLANE) * SUBLANE)
    padded_rows = pl.cdiv(rows, tile_rows) * tile_rows
    padded_total = padded_rows * LANE

    if padded_total != total:
        flat = jnp.pad(flat, (0, padded_total - total))  # relu(0) = 0; sliced off below
    slab = flat.reshape(padded_rows, LANE)

    out_slab = pl.pallas_call(
        relu_kernel,
        out_shape=jax.ShapeDtypeStruct((padded_rows, LANE), x.dtype),
        grid_spec=pltpu.PrefetchScalarGridSpec(
            num_scalar_prefetch=0,
            grid=(padded_rows // tile_rows,),
            in_specs=[pl.BlockSpec((tile_rows, LANE), lambda i: (i, 0))],
            out_specs=pl.BlockSpec((tile_rows, LANE), lambda i: (i, 0)),
        ),
        compiler_params=pltpu.CompilerParams(
            dimension_semantics=("parallel",),  # shard row tiles across v7x's 2 TCs
        ),
        input_output_aliases={0: 0},  # in-place relu on the slab (slab is not reused)
    )(slab)

    return out_slab.reshape(-1)[:total].reshape(orig_shape)


@jax.jit
def perceptron_forward(x, weight, bias):
    """x: (N, 1) f32; weight: (1, 1) f32; bias: (1, 1) f32 -> (N, 1) f32.

    Matches the reference module: fc(x) is computed-then-overwritten in the
    original forward, so the returned value is relu(x).  The dead Linear is
    therefore not lowered into the kernel (weight/bias intentionally unused).
    """
    del weight, bias  # fc output is discarded by the reference forward
    return _relu_lane_dense(x)


if __name__ == "__main__":
    key = jax.random.PRNGKey(0)
    kx, kw, kb, kx2 = jax.random.split(key, 4)

    # Small shapes consistent with Linear(1, 1): batch of 8 scalars.
    x = jax.random.normal(kx, (8, 1), dtype=jnp.float32)

    # PyTorch Linear(1,1) default init: U(-1/sqrt(in), 1/sqrt(in)) with in=1.
    weight = jax.random.uniform(kw, (1, 1), dtype=jnp.float32, minval=-1.0, maxval=1.0)
    bias = jax.random.uniform(kb, (1, 1), dtype=jnp.float32, minval=-1.0, maxval=1.0)

    out = perceptron_forward(x, weight, bias)
    jax.block_until_ready(out)

    ref = jnp.maximum(x, 0.0)
    assert out.shape == x.shape and out.dtype == x.dtype
    assert jnp.allclose(out, ref), "mismatch vs reference relu(x)"

    # Also exercise the padded / multi-tile path with a batch that is not a
    # multiple of 128 to verify tail handling.
    x2 = jax.random.normal(kx2, (1000, 1), dtype=jnp.float32)
    out2 = perceptron_forward(x2, weight, bias)
    jax.block_until_ready(out2)
    assert out2.shape == x2.shape
    assert jnp.allclose(out2, jnp.maximum(x2, 0.0)), "mismatch on padded path"

    print("KERNEL_OK")
</pallas_src>

<mosaic_0001>
module attributes {stable_mosaic.version = 11 : i64} {
  func.func @relu_kernel(%arg0: i32, %arg1: memref<8x128xf32, #tpu.memory_space<vmem>>, %arg2: memref<8x128xf32, #tpu.memory_space<vmem>>) attributes {dimension_semantics = [#tpu.dimension_semantics<parallel>], iteration_bounds = array<i64: 1>, scalar_prefetch = 0 : i64, scratch_operands = 0 : i64, tpu.core_type = #tpu.core_type<tc>, window_params = [{transform_indices = @transform_0, window_bounds = array<i64: 8, 128>}, {transform_indices = @transform_1, window_bounds = array<i64: 8, 128>}]} {
    %c0 = arith.constant 0 : index
    %c0_0 = arith.constant 0 : index
    %0 = vector.load %arg1[%c0, %c0_0] : memref<8x128xf32, #tpu.memory_space<vmem>>, vector<8x128xf32>
    %cst = arith.constant 0.000000e+00 : f32
    %1 = vector.broadcast %cst : f32 to vector<8x128xf32>
    %2 = arith.maximumf %0, %1 : vector<8x128xf32>
    %c0_1 = arith.constant 0 : index
    %c0_2 = arith.constant 0 : index
    %3 = vector.load %arg2[%c0_1, %c0_2] : memref<8x128xf32, #tpu.memory_space<vmem>>, vector<8x128xf32>
    tpu.vector_store %arg2[%c0_1, %c0_2], %2 {strides = array<i32>} : memref<8x128xf32, #tpu.memory_space<vmem>>, vector<8x128xf32>,
    return
  }
  func.func @transform_0(%arg0: i32) -> (i32, i32) {
    %c0_i32 = arith.constant 0 : i32
    %c0_i32_0 = arith.constant 0 : i32
    return %arg0, %c0_i32 : i32, i32
  }
  func.func @transform_1(%arg0: i32) -> (i32, i32) {
    %c0_i32 = arith.constant 0 : i32
    %c0_i32_0 = arith.constant 0 : i32
    return %arg0, %c0_i32 : i32, i32
  }
}

</mosaic_0001>

<bundles_post_ra>
// kernel: perceptron_forward.1
= control target key start
LH: loop header
LB: loop body
LE: loop exit
PB: predicated region body
PF: predicated region fallthrough
CT: control target
= control target key end

     0   :  { %s31_s0 = inlined_call_operand.vmem [shape: f32[8,128], index: 0, kind: input, shape index: {}, may-alias: {0,1}]   ;;  %s32_s1 = inlined_call_operand.vmem [shape: f32[8,128], index: 1, kind: output, shape index: {}, may-alias: {0,1}]  }
   0x1   :  { %v8_v0 = vld [vmem:[%s31_s0] sm:$0xff] }
   0x2   :  { %v9_v1 = vmax.f32 %v8_v0, 0.0 }
   0x4   :  { %10 = vst [vmem:[%s32_s1] sm:$0xff] %v9_v1 }

</bundles_post_ra>
